<compile_context>
chip_gen: v6e
topology: v6e:2x2x1
jax: 0.10.0
libtpu: 0.0.40
codegen_flags: <defaults>
</compile_context>

<pallas_src>
import jax
import jax.numpy as jnp
from jax.experimental import pallas as pl
from jax.experimental.pallas import tpu as pltpu

LANE = 128               # pad all lane (last) dims to a multiple of 128
FUSED_MAX_NODES = 1024   # bf16 A resident: 2 MiB at N=1024; safe on v5e/v6e/v7x
ROW_TILE = 128           # TM for tiled path; raise to 256 on v6e (128 MiB VMEM),
                         # keep 128 for v5e (16 MiB scoped default) / v7x (64 MiB)
VMEM_LIMIT_BYTES = 48 * 1024 * 1024   # explicit scoped VMEM; < 64 MiB (v7x physical)


# ----------------------------------------------------------------------------
# helpers
# ----------------------------------------------------------------------------
def _round_up(v, m):
    return ((v + m - 1) // m) * m


def _pad2(a, shape):
    """Zero-pad a 2-D array up to `shape`."""
    return jnp.pad(a, [(0, t - s) for s, t in zip(a.shape, shape)])


def _prep_params(x, w1, b1, w2, b2):
    """Pad lane dims of parameters to multiples of 128; weights -> bf16."""
    fin_p = _round_up(x.shape[1], LANE)
    hid_p = _round_up(w1.shape[1], LANE)
    cls_p = _round_up(w2.shape[1], LANE)
    w1_p = _pad2(w1, (fin_p, hid_p)).astype(jnp.bfloat16)
    b1_p = _pad2(b1, (1, hid_p)).astype(jnp.float32)
    w2_p = _pad2(w2, (hid_p, cls_p)).astype(jnp.bfloat16)
    b2_p = _pad2(b2, (1, cls_p)).astype(jnp.float32)
    return fin_p, hid_p, cls_p, w1_p, b1_p, w2_p, b2_p


def _norm_inputs(adj, n_p):
    """Padded f32 adjacency, f32 deg^{-1/2}, and compact (bf16 / int8) copies."""
    adj_f = _pad2(adj.astype(jnp.float32), (n_p, n_p))
    deg = jnp.sum(adj_f, axis=1, keepdims=True)                # f32 (exact)
    s = jnp.where(deg > 0.0, jax.lax.rsqrt(deg), 0.0)          # (n_p, 1) f32
    return adj_f, s


# ----------------------------------------------------------------------------
# fused kernel (small / mid graphs, everything resident in VMEM)
# ----------------------------------------------------------------------------
def _gcn_fused_kernel(adj_ref, s_ref, x_ref, w1_ref, b1_ref, w2_ref, b2_ref, o_ref):
    """Single-block fused 2-layer GCN.

    adj_ref : (Np, Np) bf16 raw 0/1 adjacency
    s_ref   : (Np, 1)  f32  deg^{-1/2} (precomputed in the wrapper)
    x_ref   : (Np, Fp) bf16 padded features
    w*_ref  : bf16 padded weights ; b*_ref : (1, *) f32 padded biases
    o_ref   : (Np, Cp) f32
    """
    a = adj_ref[...]
    s = s_ref[...]

    # Layer 1:  Ahat @ (X @ W1) + b1  ==  s * (A @ (s * (X @ W1))) + b1
    xw = jnp.dot(x_ref[...], w1_ref[...], preferred_element_type=jnp.float32)
    h1 = s * jnp.dot(a, (s * xw).astype(jnp.bfloat16),
                     preferred_element_type=jnp.float32) + b1_ref[...]
    h1 = jnp.maximum(h1, 0.0)

    # Layer 2:  Ahat @ (H1 @ W2) + b2
    hw = jnp.dot(h1.astype(jnp.bfloat16), w2_ref[...],
                 preferred_element_type=jnp.float32)
    o_ref[...] = s * jnp.dot(a, (s * hw).astype(jnp.bfloat16),
                             preferred_element_type=jnp.float32) + b2_ref[...]


def _gcn_forward_fused(adj, x, w1, b1, w2, b2):
    n = adj.shape[0]
    n_p = _round_up(n, LANE)
    fin_p, hid_p, cls_p, w1_p, b1_p, w2_p, b2_p = _prep_params(x, w1, b1, w2, b2)
    adj_f, s = _norm_inputs(adj, n_p)
    adj_b = adj_f.astype(jnp.bfloat16)            # exact for 0/1 adjacency
    x_p = _pad2(x.astype(jnp.float32), (n_p, fin_p)).astype(jnp.bfloat16)

    vmem = pl.BlockSpec(memory_space=pltpu.MemorySpace.VMEM)
    flops = 2 * n_p * (fin_p * hid_p + n_p * hid_p + hid_p * cls_p + n_p * cls_p)
    bytes_accessed = (2 * n_p * n_p + 4 * n_p + 2 * n_p * fin_p
                      + 2 * fin_p * hid_p + 4 * hid_p
                      + 2 * hid_p * cls_p + 4 * cls_p + 4 * n_p * cls_p)
    out = pl.pallas_call(
        _gcn_fused_kernel,
        out_shape=jax.ShapeDtypeStruct((n_p, cls_p), jnp.float32),
        in_specs=[vmem] * 7,
        out_specs=vmem,
        compiler_params=pltpu.CompilerParams(vmem_limit_bytes=VMEM_LIMIT_BYTES),
        cost_estimate=pl.CostEstimate(flops=int(flops), transcendentals=0,
                                      bytes_accessed=int(bytes_accessed)),
    )(adj_b, s, x_p, w1_p, b1_p, w2_p, b2_p)
    return out[:n, : w2.shape[1]]


# ----------------------------------------------------------------------------
# tiled kernels (transform-before-aggregate, row-blocked over the adjacency)
# ----------------------------------------------------------------------------
def _transform_kernel(xs_ref, w_ref, o_ref):
    """o = xs_blk @ W   (xs already pre-scaled by deg^{-1/2}); bf16 output."""
    o_ref[...] = jnp.dot(xs_ref[...], w_ref[...],
                         preferred_element_type=jnp.float32).astype(o_ref.dtype)


def _agg_relu_transform_kernel(a_ref, s_ref, feat_ref, b_ref, w_ref, o_ref):
    """o = ( s * relu( s * (A_blk @ feat) + b ) ) @ W_next.

    Aggregation for this layer fused with the NEXT layer's feature transform so
    the resident feature matrix stays at the narrower width (N x Hid / N x Cls).
    a_ref is int8 (halves the HBM-bound adjacency stream); cast is VPU work
    hidden under the DMA pipeline.  Epilogue stays f32 (v5e has no bf16 VPU).
    """
    a = a_ref[...].astype(jnp.bfloat16)
    agg = jnp.dot(a, feat_ref[...], preferred_element_type=jnp.float32)
    s = s_ref[...]
    h = jnp.maximum(s * agg + b_ref[...], 0.0)
    o_ref[...] = jnp.dot((s * h).astype(jnp.bfloat16), w_ref[...],
                         preferred_element_type=jnp.float32).astype(o_ref.dtype)


def _agg_bias_kernel(a_ref, s_ref, feat_ref, b_ref, o_ref):
    """o = s * (A_blk @ feat) + b   (final aggregation, no activation)."""
    a = a_ref[...].astype(jnp.bfloat16)
    agg = jnp.dot(a, feat_ref[...], preferred_element_type=jnp.float32)
    o_ref[...] = (s_ref[...] * agg + b_ref[...]).astype(o_ref.dtype)


def _call_transform(xs_b, w_p, *, tm):
    n_p, fin_p = xs_b.shape
    gp = w_p.shape[1]
    flops = 2 * n_p * fin_p * gp
    bytes_accessed = 2 * n_p * fin_p + 2 * fin_p * gp + 2 * n_p * gp
    return pl.pallas_call(
        _transform_kernel,
        out_shape=jax.ShapeDtypeStruct((n_p, gp), jnp.bfloat16),
        grid_spec=pltpu.PrefetchScalarGridSpec(
            num_scalar_prefetch=0,
            grid=(n_p // tm,),
            in_specs=[pl.BlockSpec((tm, fin_p), lambda i: (i, 0)),
                      pl.BlockSpec((fin_p, gp), lambda i: (0, 0))],
            out_specs=pl.BlockSpec((tm, gp), lambda i: (i, 0)),
        ),
        compiler_params=pltpu.CompilerParams(
            dimension_semantics=("parallel",),
            vmem_limit_bytes=VMEM_LIMIT_BYTES),
        cost_estimate=pl.CostEstimate(flops=int(flops), transcendentals=0,
                                      bytes_accessed=int(bytes_accessed)),
    )(xs_b, w_p)


def _call_aggregate(adj_i8, s, feat_b, b_p, w_p, *, tm, out_dtype):
    """One aggregation pass over row blocks of the (int8) adjacency.

    Per grid step VMEM ~ 2*TM*N (double-buffered int8 A block)
                       + 2*N*G*2 (resident bf16 features, G = Hid or Cls)
                       + small weights/bias/out  -> ~768*N bytes at TM=G=128,
    i.e. well under VMEM_LIMIT_BYTES up to N ~ 16K on every generation.
    # NOTE: for very large N, a K-tiled (source-block) variant with an f32
    # accumulator and pl.Buffered(1) on the constant-index blocks would bound
    # VMEM further; not needed at these scales.
    """
    n_p = adj_i8.shape[0]
    gp = feat_b.shape[1]
    go = w_p.shape[1] if w_p is not None else gp

    in_specs = [
        pl.BlockSpec((tm, n_p), lambda i: (i, 0)),       # int8 adjacency row block
        pl.BlockSpec((tm, 1), lambda i: (i, 0)),         # deg^{-1/2} rows (f32)
        pl.BlockSpec((n_p, gp), lambda i: (0, 0)),       # resident pre-transformed feats
        pl.BlockSpec((1, gp), lambda i: (0, 0)),         # bias (f32)
    ]
    operands = [adj_i8, s, feat_b, b_p]
    if w_p is not None:
        in_specs.append(pl.BlockSpec((gp, go), lambda i: (0, 0)))
        operands.append(w_p)
        kernel = _agg_relu_transform_kernel
    else:
        kernel = _agg_bias_kernel

    flops = 2 * n_p * n_p * gp + (2 * n_p * gp * go if w_p is not None else 0)
    bytes_accessed = (n_p * n_p + 4 * n_p + 2 * n_p * gp + 4 * gp
                      + (2 * gp * go if w_p is not None else 0)
                      + jnp.dtype(out_dtype).itemsize * n_p * go)

    return pl.pallas_call(
        kernel,
        out_shape=jax.ShapeDtypeStruct((n_p, go), out_dtype),
        grid_spec=pltpu.PrefetchScalarGridSpec(
            num_scalar_prefetch=0,
            grid=(n_p // tm,),
            in_specs=in_specs,
            out_specs=pl.BlockSpec((tm, go), lambda i: (i, 0)),
        ),
        compiler_params=pltpu.CompilerParams(
            dimension_semantics=("parallel",),   # row blocks split across TCs
            vmem_limit_bytes=VMEM_LIMIT_BYTES),
        cost_estimate=pl.CostEstimate(flops=int(flops), transcendentals=0,
                                      bytes_accessed=int(bytes_accessed)),
    )(*operands)


def _gcn_forward_tiled(adj, x, w1, b1, w2, b2, *, tm=ROW_TILE):
    n = adj.shape[0]
    n_p = _round_up(n, max(tm, LANE))
    fin_p, hid_p, cls_p, w1_p, b1_p, w2_p, b2_p = _prep_params(x, w1, b1, w2, b2)
    adj_f, s = _norm_inputs(adj, n_p)
    # int8 adjacency is exact only for 0/1 adjacencies (the GraphConv case).
    adj_i8 = adj_f.astype(jnp.int8)
    xs_b = (s * _pad2(x.astype(jnp.float32), (n_p, fin_p))).astype(jnp.bfloat16)

    # T1 = (s*X) @ W1                               (N x Hid, bf16)
    t1 = _call_transform(xs_b, w1_p, tm=tm)
    # T2 = ( s * relu( s*(A @ T1) + b1 ) ) @ W2     (N x Cls, bf16)
    t2 = _call_aggregate(adj_i8, s, t1, b1_p, w2_p, tm=tm, out_dtype=jnp.bfloat16)
    # Out = s * (A @ T2) + b2                       (N x Cls, f32)
    out = _call_aggregate(adj_i8, s, t2, b2_p, None, tm=tm, out_dtype=jnp.float32)
    return out[:n, : w2.shape[1]]


def gcn_forward(adj, x, w1, b1, w2, b2):
    """2-layer GCN forward. `adj` is the raw dense 0/1 adjacency (with self
    loops so deg > 0); symmetric normalization is fused into the kernels."""
    if adj.shape[0] <= FUSED_MAX_NODES:
        return _gcn_forward_fused(adj, x, w1, b1, w2, b2)
    return _gcn_forward_tiled(adj, x, w1, b1, w2, b2)


# ----------------------------------------------------------------------------
# pure-JAX references
# ----------------------------------------------------------------------------
def _reference_f32(adj, x, w1, b1, w2, b2):
    deg = jnp.sum(adj, axis=1)
    s = jnp.where(deg > 0, 1.0 / jnp.sqrt(deg), 0.0)
    a_hat = adj * s[:, None] * s[None, :]
    h1 = jnp.maximum(a_hat @ (x @ w1) + b1, 0.0)
    return a_hat @ (h1 @ w2) + b2


def _reference_bf16_fused(adj, x, w1, b1, w2, b2):
    """Mirrors the fused kernel's bf16/f32 mixed precision exactly."""
    n = adj.shape[0]
    n_p = _round_up(n, LANE)
    fin_p, hid_p, cls_p, w1_p, b1_p, w2_p, b2_p = _prep_params(x, w1, b1, w2, b2)
    adj_f, s = _norm_inputs(adj, n_p)
    a_b = adj_f.astype(jnp.bfloat16)
    x_p = _pad2(x.astype(jnp.float32), (n_p, fin_p)).astype(jnp.bfloat16)
    xw = jnp.dot(x_p, w1_p, preferred_element_type=jnp.float32)
    h1 = s * jnp.dot(a_b, (s * xw).astype(jnp.bfloat16),
                     preferred_element_type=jnp.float32) + b1_p
    h1 = jnp.maximum(h1, 0.0)
    hw = jnp.dot(h1.astype(jnp.bfloat16), w2_p, preferred_element_type=jnp.float32)
    out = s * jnp.dot(a_b, (s * hw).astype(jnp.bfloat16),
                      preferred_element_type=jnp.float32) + b2_p
    return out[:n, : w2.shape[1]]


def _reference_bf16_tiled(adj, x, w1, b1, w2, b2, *, tm=ROW_TILE):
    """Mirrors the tiled kernels' bf16/f32 mixed precision exactly."""
    n = adj.shape[0]
    n_p = _round_up(n, max(tm, LANE))
    fin_p, hid_p, cls_p, w1_p, b1_p, w2_p, b2_p = _prep_params(x, w1, b1, w2, b2)
    adj_f, s = _norm_inputs(adj, n_p)
    a_b = adj_f.astype(jnp.bfloat16)            # == int8 -> bf16 for 0/1 entries
    xs_b = (s * _pad2(x.astype(jnp.float32), (n_p, fin_p))).astype(jnp.bfloat16)
    t1 = jnp.dot(xs_b, w1_p, preferred_element_type=jnp.float32).astype(jnp.bfloat16)
    agg1 = jnp.dot(a_b, t1, preferred_element_type=jnp.float32)
    h1 = jnp.maximum(s * agg1 + b1_p, 0.0)
    t2 = jnp.dot((s * h1).astype(jnp.bfloat16), w2_p,
                 preferred_element_type=jnp.float32).astype(jnp.bfloat16)
    agg2 = jnp.dot(a_b, t2, preferred_element_type=jnp.float32)
    out = s * agg2 + b2_p
    return out[:n, : w2.shape[1]]


# ----------------------------------------------------------------------------
# demo / self-test
# ----------------------------------------------------------------------------
def _glorot_uniform(key, shape):
    fan_in, fan_out = shape
    limit = jnp.sqrt(6.0 / (fan_in + fan_out))
    return jax.random.uniform(key, shape, jnp.float32, -limit, limit)


def _random_graph(key, n, p=0.2):
    rand = jax.random.uniform(key, (n, n))
    adj = (rand < p).astype(jnp.float32)
    adj = jnp.maximum(adj, adj.T)                             # undirected
    adj = jnp.maximum(adj, jnp.eye(n, dtype=jnp.float32))     # self loops -> deg > 0
    return adj


if __name__ == "__main__":
    key = jax.random.PRNGKey(0)

    # --- small, module-consistent shapes -> fused single-block kernel --------
    n, fin, hid, ncls = 32, 16, 32, 8
    ka, kx, kw1, kb1, kw2, kb2, key = jax.random.split(key, 7)
    adj = _random_graph(ka, n)
    x = jax.random.normal(kx, (n, fin), jnp.float32)
    w1 = _glorot_uniform(kw1, (fin, hid))
    b1 = 0.1 * jax.random.normal(kb1, (1, hid), jnp.float32)
    w2 = _glorot_uniform(kw2, (hid, ncls))
    b2 = 0.1 * jax.random.normal(kb2, (1, ncls), jnp.float32)

    out = jax.block_until_ready(gcn_forward(adj, x, w1, b1, w2, b2))
    assert out.shape == (n, ncls)
    assert jnp.allclose(out, _reference_bf16_fused(adj, x, w1, b1, w2, b2),
                        atol=1e-3, rtol=1e-3)
    assert jnp.allclose(out, _reference_f32(adj, x, w1, b1, w2, b2),
                        atol=1e-1, rtol=1e-1)

    # --- moderate graph -> exercise the row-tiled (int8 A, 3-call) path ------
    n2, fin2, hid2, ncls2 = 384, 48, 32, 10
    ka2, kx2, kw12, kw22, key = jax.random.split(key, 5)
    adj2 = _random_graph(ka2, n2, p=0.05)
    x2 = jax.random.normal(kx2, (n2, fin2), jnp.float32)
    w1l = _glorot_uniform(kw12, (fin2, hid2))
    b1l = jnp.zeros((1, hid2), jnp.float32)
    w2l = _glorot_uniform(kw22, (hid2, ncls2))
    b2l = jnp.zeros((1, ncls2), jnp.float32)

    out2 = jax.block_until_ready(_gcn_forward_tiled(adj2, x2, w1l, b1l, w2l, b2l))
    assert out2.shape == (n2, ncls2)
    assert jnp.allclose(out2, _reference_bf16_tiled(adj2, x2, w1l, b1l, w2l, b2l),
                        atol=1e-3, rtol=1e-3)
    assert jnp.allclose(out2, _reference_f32(adj2, x2, w1l, b1l, w2l, b2l),
                        atol=2e-1, rtol=2e-1)

    print("KERNEL_OK")
</pallas_src>

<mosaic_0001>
module attributes {stable_mosaic.version = 11 : i64} {
  func.func @_gcn_fused_kernel(%arg0: memref<128x128xbf16, #tpu.memory_space<vmem>>, %arg1: memref<128x1xf32, #tpu.memory_space<vmem>>, %arg2: memref<128x128xbf16, #tpu.memory_space<vmem>>, %arg3: memref<128x128xbf16, #tpu.memory_space<vmem>>, %arg4: memref<1x128xf32, #tpu.memory_space<vmem>>, %arg5: memref<128x128xbf16, #tpu.memory_space<vmem>>, %arg6: memref<1x128xf32, #tpu.memory_space<vmem>>, %arg7: memref<128x128xf32, #tpu.memory_space<vmem>>) attributes {dimension_semantics = [], scalar_prefetch = 0 : i64, scratch_operands = 0 : i64, tpu.core_type = #tpu.core_type<tc>} {
    %c0 = arith.constant 0 : index
    %c0_0 = arith.constant 0 : index
    %0 = vector.load %arg0[%c0, %c0_0] : memref<128x128xbf16, #tpu.memory_space<vmem>>, vector<128x128xbf16>
    %c0_1 = arith.constant 0 : index
    %c0_2 = arith.constant 0 : index
    %1 = vector.load %arg1[%c0_1, %c0_2] : memref<128x1xf32, #tpu.memory_space<vmem>>, vector<128x1xf32>
    %c0_3 = arith.constant 0 : index
    %c0_4 = arith.constant 0 : index
    %2 = vector.load %arg2[%c0_3, %c0_4] : memref<128x128xbf16, #tpu.memory_space<vmem>>, vector<128x128xbf16>
    %c0_5 = arith.constant 0 : index
    %c0_6 = arith.constant 0 : index
    %3 = vector.load %arg3[%c0_5, %c0_6] : memref<128x128xbf16, #tpu.memory_space<vmem>>, vector<128x128xbf16>
    %cst = arith.constant dense<0.000000e+00> : vector<128x128xf32>
    %4 = tpu.matmul %2, %3, %cst {dimension_numbers = #tpu.dot_dimension_numbers<[1], [0], [0], [1], [0, 0, 1, 1], [], []>} : vector<128x128xbf16>, vector<128x128xbf16>, vector<128x128xf32> -> vector<128x128xf32>
    %5 = vector.broadcast %1 : vector<128x1xf32> to vector<128x128xf32>
    %6 = arith.mulf %5, %4 : vector<128x128xf32>
    %7 = arith.truncf %6 : vector<128x128xf32> to vector<128x128xbf16>
    %cst_7 = arith.constant dense<0.000000e+00> : vector<128x128xf32>
    %8 = tpu.matmul %0, %7, %cst_7 {dimension_numbers = #tpu.dot_dimension_numbers<[1], [0], [0], [1], [0, 0, 1, 1], [], []>} : vector<128x128xbf16>, vector<128x128xbf16>, vector<128x128xf32> -> vector<128x128xf32>
    %9 = vector.broadcast %1 : vector<128x1xf32> to vector<128x128xf32>
    %10 = arith.mulf %9, %8 : vector<128x128xf32>
    %c0_8 = arith.constant 0 : index
    %c0_9 = arith.constant 0 : index
    %11 = vector.load %arg4[%c0_8, %c0_9] : memref<1x128xf32, #tpu.memory_space<vmem>>, vector<1x128xf32>
    %12 = vector.broadcast %11 : vector<1x128xf32> to vector<128x128xf32>
    %13 = arith.addf %10, %12 : vector<128x128xf32>
    %cst_10 = arith.constant 0.000000e+00 : f32
    %14 = vector.broadcast %cst_10 : f32 to vector<128x128xf32>
    %15 = arith.maximumf %13, %14 : vector<128x128xf32>
    %16 = arith.truncf %15 : vector<128x128xf32> to vector<128x128xbf16>
    %c0_11 = arith.constant 0 : index
    %c0_12 = arith.constant 0 : index
    %17 = vector.load %arg5[%c0_11, %c0_12] : memref<128x128xbf16, #tpu.memory_space<vmem>>, vector<128x128xbf16>
    %cst_13 = arith.constant dense<0.000000e+00> : vector<128x128xf32>
    %18 = tpu.matmul %16, %17, %cst_13 {dimension_numbers = #tpu.dot_dimension_numbers<[1], [0], [0], [1], [0, 0, 1, 1], [], []>} : vector<128x128xbf16>, vector<128x128xbf16>, vector<128x128xf32> -> vector<128x128xf32>
    %19 = vector.broadcast %1 : vector<128x1xf32> to vector<128x128xf32>
    %20 = arith.mulf %19, %18 : vector<128x128xf32>
    %21 = arith.truncf %20 : vector<128x128xf32> to vector<128x128xbf16>
    %cst_14 = arith.constant dense<0.000000e+00> : vector<128x128xf32>
    %22 = tpu.matmul %0, %21, %cst_14 {dimension_numbers = #tpu.dot_dimension_numbers<[1], [0], [0], [1], [0, 0, 1, 1], [], []>} : vector<128x128xbf16>, vector<128x128xbf16>, vector<128x128xf32> -> vector<128x128xf32>
    %23 = vector.broadcast %1 : vector<128x1xf32> to vector<128x128xf32>
    %24 = arith.mulf %23, %22 : vector<128x128xf32>
    %c0_15 = arith.constant 0 : index
    %c0_16 = arith.constant 0 : index
    %25 = vector.load %arg6[%c0_15, %c0_16] : memref<1x128xf32, #tpu.memory_space<vmem>>, vector<1x128xf32>
    %26 = vector.broadcast %25 : vector<1x128xf32> to vector<128x128xf32>
    %27 = arith.addf %24, %26 : vector<128x128xf32>
    %c0_17 = arith.constant 0 : index
    %c0_18 = arith.constant 0 : index
    %28 = vector.load %arg7[%c0_17, %c0_18] : memref<128x128xf32, #tpu.memory_space<vmem>>, vector<128x128xf32>
    tpu.vector_store %arg7[%c0_17, %c0_18], %27 {strides = array<i32>} : memref<128x128xf32, #tpu.memory_space<vmem>>, vector<128x128xf32>,
    return
  }
}

</mosaic_0001>

<bundles_post_ra>
// kernel: tpu_custom_call.1
= control target key start
LH: loop header
LB: loop body
LE: loop exit
PB: predicated region body
PF: predicated region fallthrough
CT: control target
= control target key end

     0   :  { %12 = vsyncpa [#allocation3], 0  ;;  %s1640_s0 = inlined_call_operand.vmem [shape: bf16[128,128], index: 0, kind: input, shape index: {}]   ;;  %s1641_s1 = inlined_call_operand.vmem [shape: f32[128,1], index: 1, kind: input, shape index: {}]   ;;  %s1642_s2 = inlined_call_operand.vmem [shape: bf16[128,128], index: 2, kind: input, shape index: {}]   ;;  %s1643_s3 = inlined_call_operand.hbm [shape: bf16[128,128], index: 3, kind: input, shape index: {}]   ;;  %s1644_s4 = inlined_call_operand.vmem [shape: f32[1,128], index: 4, kind: input, shape index: {}]   ;;  %s1645_s5 = inlined_call_operand.hbm [shape: bf16[128,128], index: 5, kind: input, shape index: {}]   ;;  %s1646_s6 = inlined_call_operand.vmem [shape: f32[1,128], index: 6, kind: input, shape index: {}]   ;;  %s1647_s7 = inlined_call_operand.hbm [shape: f32[128,128], index: 7, kind: output, shape index: {}]  }
   0x1   :  { %13 = vsyncpa [#allocation6], 0 }
   0x2   :  { %14 = vsyncpa [#allocation4], 0  ;;  %s1314_s24 = smov [#allocation2]  }
   0x3   :  { %s26_s25 = sshll.u32 %s1314_s24, 4  ;;  %s27_s25 = int_to_ptr.vmem [resolvable:$true] %s26_s25 }
   0x4   :  { %s1256_s26 = scalar_lea.vmem %s27_s25, 1024  ;;  %p1261_p1 = scmp.lt.s32.totalorder %s27_s25, %s27_s25 }
   0x5   :  { %p1257_p0 = scmp.ne.s32.totalorder %s27_s25, %s1256_s26  ;;  %p1262_p2 = scmp.lt.s32.totalorder %s1256_s26, %s1256_s26 }
   0x7   :  { %p1263_p3 = por %p1262_p2, %p1261_p1 }
   0x9   :  { %p1264_p4 = pnand %p1263_p3, %p1257_p0 }
   0xb   :  { %1267 = shalt.err (!%p1264_p4)
}
   0xc   :  { %s1315_s27 = smov 64   ;;  %s1316_s28 = smov 4  }
   0xd   :  { %32 = dma.hbm_to_vmem [thread:$0]  %s1643_s3, 1024, %s27_s25, [#allocation3], %s1315_s27, %s1315_s27, %s1316_s28  }
   0xe   :  { %s1317_s8 = smov [#allocation5]  }
   0xf   :  { %s40_s9 = sshll.u32 %s1317_s8, 4  ;;  %s41_s9 = int_to_ptr.vmem [resolvable:$true] %s40_s9 }
  0x10   :  { %s1276_s10 = scalar_lea.vmem %s41_s9, 1024  ;;  %p1281_p6 = scmp.lt.s32.totalorder %s41_s9, %s41_s9 }
  0x11   :  { %p1277_p5 = scmp.ne.s32.totalorder %s41_s9, %s1276_s10  ;;  %p1282_p7 = scmp.lt.s32.totalorder %s1276_s10, %s1276_s10 }
  0x13   :  { %p1283_p8 = por %p1282_p7, %p1281_p6 }
  0x15   :  { %p1284_p9 = pnand %p1283_p8, %p1277_p5 }
  0x17   :  { %1287 = shalt.err (!%p1284_p9)
}
  0x18   :  { %46 = dma.hbm_to_vmem [thread:$0]  %s1645_s5, 1024, %s41_s9, [#allocation6], %s1315_s27, %s1315_s27, %s1316_s28  }
  0x19   :  { %1308 = dma.done.wait [#allocation3], 1024  }
  0x1a   :  { %1309 = vsyncadd [#allocation3], 4294966272 }
  0x1b   :  { %1310 = dma.done.wait [#allocation6], 1024  }
  0x1c   :  { %1311 = vsyncadd [#allocation6], 4294966272  ;;  %v1318_v0 = vmov 0   ;;  %v1216_v1 = vld [vmem:[#allocation2 + $0x38] sm:$0xff]   ;;  %v1217_v2 = vld [vmem:[#allocation2 + $0x30] sm:$0xff]  }
  0x1d   :  { %1214 = vset.pattern.permute.xlu0 %v1318_v0  ;;  %1215 = vset.pattern.permute.xlu1 %v1318_v0  ;;  %v1218_v3 = vld [vmem:[#allocation2 + $0x28] sm:$0xff]   ;;  %v1219_v4 = vld [vmem:[#allocation2 + $0x20] sm:$0xff]   ;;  %v1220_v6 = vld [vmem:[#allocation2 + $0x18] sm:$0xff]  }
  0x1e   :  { %1078 = vmatprep.subr.bf16.mxu0 %v1216_v1  ;;  %v1224_v5 = vld [vmem:[%s1642_s2] sm:$0xff]   ;;  %v1221_v7 = vld [vmem:[#allocation2 + $0x10] sm:$0xff]   ;;  %v87_v10 = vld [vmem:[%s1641_s1 + $0x78] sm:$0xff] }
  0x1f   :  { %1079 = vmatpush3.bf16.msra.mxu0 %v1216_v1  ;;  %1094 = vmatprep.mubr.bf16.mxu0 %v1224_v5  ;;  %v86_v8 = vld [vmem:[%s1641_s1 + $0x70] sm:$0xff]  ;;  %v84_v9 = vld [vmem:[%s1641_s1 + $0x60] sm:$0xff]  ;;  %v85_v11 = vld [vmem:[%s1641_s1 + $0x68] sm:$0xff] }
  0x20   :  { %1080 = vmatprep.subr.bf16.mxu0 %v1217_v2  ;;  %385 = vperm.xlu0 %1214, %v86_v8   ;;  %v1222_v12 = vld [vmem:[#allocation2 + $0x8] sm:$0xff]   ;;  %v82_v13 = vld [vmem:[%s1641_s1 + $0x50] sm:$0xff]  ;;  %v83_v14 = vld [vmem:[%s1641_s1 + $0x58] sm:$0xff] }
  0x21   :  { %375 = vperm.xlu1 %1215, %v84_v9   ;;  %v1223_v15 = vld [vmem:[#allocation2] sm:$0xff]   ;;  %v81_v17 = vld [vmem:[%s1641_s1 + $0x48] sm:$0xff]  ;;  %v78_v19 = vld [vmem:[%s1641_s1 + $0x30] sm:$0xff] }
  0x22   :  { %v80_v16 = vld [vmem:[%s1641_s1 + $0x40] sm:$0xff]  ;;  %v1225_v18 = vld [vmem:[%s1642_s2 + $0x8] sm:$0xff]   ;;  %v79_v20 = vld [vmem:[%s1641_s1 + $0x38] sm:$0xff] }
  0x23   :  { %1081 = vmatpush3.bf16.msra.mxu0 %v1217_v2  ;;  %v1226_v21 = vld [vmem:[%s1642_s2 + $0x10] sm:$0xff]   ;;  %v76_v22 = vld [vmem:[%s1641_s1 + $0x20] sm:$0xff]  ;;  %v77_v23 = vld [vmem:[%s1641_s1 + $0x28] sm:$0xff] }
  0x24   :  { %1082 = vmatprep.subr.bf16.mxu0 %v1218_v3  ;;  %390 = vperm.xlu0 %1214, %v87_v10   ;;  %v1227_v24 = vld [vmem:[%s1642_s2 + $0x18] sm:$0xff]   ;;  %v74_v25 = vld [vmem:[%s1641_s1 + $0x10] sm:$0xff]  ;;  %v1228_v27 = vld [vmem:[%s1642_s2 + $0x20] sm:$0xff]  }
  0x25   :  { %380 = vperm.xlu1 %1215, %v85_v11   ;;  %v75_v26 = vld [vmem:[%s1641_s1 + $0x18] sm:$0xff]  ;;  %v72_v28 = vld [vmem:[%s1641_s1] sm:$0xff]  ;;  %v73_v29 = vld [vmem:[%s1641_s1 + $0x8] sm:$0xff] }
  0x26   :  { %v1229_v30 = vld [vmem:[%s1642_s2 + $0x28] sm:$0xff]   ;;  %v1230_v31 = vld [vmem:[%s1642_s2 + $0x30] sm:$0xff]   ;;  %v1231_v32 = vld [vmem:[%s1642_s2 + $0x38] sm:$0xff]  }
  0x27   :  { %1083 = vmatpush3.bf16.msra.mxu0 %v1218_v3  ;;  %v1443_v33 = vld [vmem:[%s1640_s0] sm:$0xff]   ;;  %v1240_v34 = vld [vmem:[#allocation5 + $0x38] sm:$0xff]   ;;  %v1241_v35 = vld [vmem:[#allocation5 + $0x30] sm:$0xff]  }
  0x28   :  { %1084 = vmatprep.subr.bf16.mxu0 %v1219_v4  ;;  %365 = vperm.xlu0 %1214, %v82_v13   ;;  %v1242_v36 = vld [vmem:[#allocation5 + $0x28] sm:$0xff]   ;;  %v1243_v37 = vld [vmem:[#allocation5 + $0x20] sm:$0xff]  }
  0x29   :  { %370 = vperm.xlu1 %1215, %v83_v14   ;;  %1126 = vmatprep.mubr.bf16.mxu1 %v1443_v33 }
  0x2b   :  { %1085 = vmatpush3.bf16.msra.mxu0 %v1219_v4 }
  0x2c   :  { %1086 = vmatprep.subr.bf16.mxu0 %v1220_v6  ;;  %355 = vperm.xlu0 %1214, %v80_v16  }
  0x2d   :  { %360 = vperm.xlu1 %1215, %v81_v17  }
  0x2f   :  { %1087 = vmatpush3.bf16.msra.mxu0 %v1220_v6 }
  0x30   :  { %1088 = vmatprep.subr.bf16.mxu0 %v1221_v7  ;;  %345 = vperm.xlu0 %1214, %v78_v19  }
  0x31   :  { %350 = vperm.xlu1 %1215, %v79_v20  }
  0x33   :  { %1089 = vmatpush3.bf16.msra.mxu0 %v1221_v7 }
  0x34   :  { %1090 = vmatprep.subr.bf16.mxu0 %v1222_v12  ;;  %335 = vperm.xlu0 %1214, %v76_v22  }
  0x35   :  { %340 = vperm.xlu1 %1215, %v77_v23  }
  0x37   :  { %1091 = vmatpush3.bf16.msra.mxu0 %v1222_v12 }
  0x38   :  { %1092 = vmatprep.subr.bf16.mxu0 %v1223_v15  ;;  %325 = vperm.xlu0 %1214, %v74_v25  }
  0x39   :  { %330 = vperm.xlu1 %1215, %v75_v26  }
  0x3b   :  { %1093 = vmatpush3.bf16.msra.mxu0 %v1223_v15 }
  0x3c   :  { %315 = vperm.xlu0 %1214, %v72_v28   ;;  %1142 = vmatprep.subr.bf16.mxu0 %v1240_v34 }
  0x3d   :  { %320 = vperm.xlu1 %1215, %v73_v29  }
  0x3e   :  { %1095 = vmatmul.mubr.bf16.vlgmr.msra.gmra.mxu0 %v1225_v18 }
  0x3f   :  { %1098 = vmatprep.mubr.bf16.mxu0 %v1226_v21  ;;  %1143 = vmatpush3.bf16.msra.mxu0 %v1240_v34  ;;  %v1517_v34 = vld [vmem:[%s1640_s0 + $0x20] sm:$0xff]  }
  0x40   :  { %1144 = vmatprep.subr.bf16.mxu0 %v1241_v35 }
  0x43   :  { %1145 = vmatpush3.bf16.msra.mxu0 %v1241_v35  ;;  %v1524_v35 = vld [vmem:[%s1640_s0 + $0x28] sm:$0xff]  }
  0x44   :  { %1146 = vmatprep.subr.bf16.mxu0 %v1242_v36 }
  0x46   :  { %1099 = vmatmul.mubr.bf16.gmra.mxu0 %v1227_v24 }
  0x47   :  { %1102 = vmatprep.mubr.bf16.mxu0 %v1228_v27  ;;  %1147 = vmatpush3.bf16.msra.mxu0 %v1242_v36  ;;  %v1529_v36 = vld [vmem:[%s1640_s0 + $0x30] sm:$0xff]  }
  0x48   :  { %1148 = vmatprep.subr.bf16.mxu0 %v1243_v37 }
  0x4b   :  { %1149 = vmatpush3.bf16.msra.mxu0 %v1243_v37  ;;  %v1536_v37 = vld [vmem:[%s1640_s0 + $0x38] sm:$0xff]  }
  0x4e   :  { %1103 = vmatmul.mubr.bf16.gmra.mxu0 %v1229_v30  ;;  %v1500_v30 = vld [vmem:[%s1640_s0 + $0x8] sm:$0xff]  }
  0x4f   :  { %1106 = vmatprep.mubr.bf16.mxu0 %v1230_v31  ;;  %v1505_v31 = vld [vmem:[%s1640_s0 + $0x10] sm:$0xff]  }
  0x56   :  { %1107 = vmatmul.mubr.bf16.gmra.mxu0 %v1231_v32  ;;  %v1512_v32 = vld [vmem:[%s1640_s0 + $0x18] sm:$0xff]  }
  0x9b   :  { %v1450_v44 = vpop.permute.xlu0 %385 }
  0x9c   :  { %v1448_v42 = vpop.permute.xlu1 %375 }
  0x9f   :  { %v1454_v49 = vpop.permute.xlu0 %390 }
  0xa0   :  { %v1452_v47 = vpop.permute.xlu1 %380 }
  0xa3   :  { %v1458_v54 = vpop.permute.xlu0 %365 }
  0xa4   :  { %v1456_v52 = vpop.permute.xlu1 %370 }
  0xa7   :  { %v1462_v59 = vpop.permute.xlu0 %355 }
  0xa8   :  { %v1460_v57 = vpop.permute.xlu1 %360 }
  0xab   :  { %v1471_v6 = vpop.permute.xlu0 %345 }
  0xac   :  { %v1468_v3 = vpop.permute.xlu1 %350 }
  0xaf   :  { %v1478_v12 = vpop.permute.xlu0 %335 }
  0xb0   :  { %v1475_v10 = vpop.permute.xlu1 %340 }
  0xb3   :  { %v1485_v19 = vpop.permute.xlu0 %325 }
  0xb4   :  { %v1482_v16 = vpop.permute.xlu1 %330 }
  0xb7   :  { %v1492_v25 = vpop.permute.xlu0 %315 }
  0xb8   :  { %v1489_v23 = vpop.permute.xlu1 %320 }
  0xfe   :  { %v1096_v38 = vpop.f32.mrf.mxu0 }
  0xff   :  { %v395_v24 = vmul.f32 %v1096_v38, %v1485_v19  ;;  %v1244_v38 = vld [vmem:[#allocation5 + $0x18] sm:$0xff]  }
 0x100   :  { %v1446_v39 = vpop.f32.mrf.mxu0  ;;  %1150 = vmatprep.subr.bf16.mxu0 %v1244_v38 }
 0x101   :  { %v393_v28 = vmul.f32 %v1492_v25, %v1446_v39  ;;  %1151 = vmatpush3.bf16.msra.mxu0 %v1244_v38  ;;  %v1245_v39 = vld [vmem:[#allocation5 + $0x10] sm:$0xff]  }
 0x102   :  { %v1097_v40 = vpop.f32.mrf.mxu0  ;;  %1152 = vmatprep.subr.bf16.mxu0 %v1245_v39 }
 0x103   :  { %v396_v21 = vmul.f32 %v1097_v40, %v1482_v16  ;;  %v1246_v40 = vld [vmem:[#allocation5 + $0x8] sm:$0xff]  }
 0x104   :  { %v253_v41 = vpop.f32.mrf.mxu0 }
 0x105   :  { %v410_v26 = vpack.c.bf16 %v396_v21, %v395_v24  ;;  %v394_v27 = vmul.f32 %v1489_v23, %v253_v41  ;;  %1153 = vmatpush3.bf16.msra.mxu0 %v1245_v39  ;;  %v1247_v41 = vld [vmem:[#allocation5] sm:$0xff]  }
 0x106   :  { %v1100_v43 = vpop.f32.mrf.mxu0  ;;  %1154 = vmatprep.subr.bf16.mxu0 %v1246_v40 }
 0x107   :  { %v399_v15 = vmul.f32 %v1100_v43, %v1471_v6  ;;  %v409_v29 = vpack.c.bf16 %v394_v27, %v393_v28 }
 0x108   :  { %v266_v45 = vpop.f32.mrf.mxu0 }
 0x109   :  { %v397_v20 = vmul.f32 %v1478_v12, %v266_v45  ;;  %1155 = vmatpush3.bf16.msra.mxu0 %v1246_v40 }
 0x10a   :  { %v1101_v46 = vpop.f32.mrf.mxu0  ;;  %1156 = vmatprep.subr.bf16.mxu0 %v1247_v41 }
 0x10b   :  { %v400_v13 = vmul.f32 %v1101_v46, %v1468_v3 }
 0x10c   :  { %v269_v48 = vpop.f32.mrf.mxu0 }
 0x10d   :  { %v412_v17 = vpack.c.bf16 %v400_v13, %v399_v15  ;;  %v398_v18 = vmul.f32 %v1475_v10, %v269_v48  ;;  %1157 = vmatpush3.bf16.msra.mxu0 %v1247_v41 }
 0x10e   :  { %v1104_v50 = vpop.f32.mrf.mxu0 }
 0x10f   :  { %v403_v7 = vmul.f32 %v1104_v50, %v1458_v54  ;;  %v411_v22 = vpack.c.bf16 %v398_v18, %v397_v20 }
 0x110   :  { %v282_v51 = vpop.f32.mrf.mxu0 }
 0x111   :  { %v401_v11 = vmul.f32 %v1462_v59, %v282_v51 }
 0x112   :  { %v1105_v53 = vpop.f32.mrf.mxu0 }
 0x113   :  { %v404_v4 = vmul.f32 %v1105_v53, %v1456_v52 }
 0x114   :  { %v285_v55 = vpop.f32.mrf.mxu0 }
 0x115   :  { %v414_v8 = vpack.c.bf16 %v404_v4, %v403_v7  ;;  %v402_v9 = vmul.f32 %v1460_v57, %v285_v55 }
 0x116   :  { %v1108_v56 = vpop.f32.mrf.mxu0 }
 0x117   :  { %v407_v61 = vmul.f32 %v1108_v56, %v1450_v44  ;;  %v413_v14 = vpack.c.bf16 %v402_v9, %v401_v11 }
 0x118   :  { %v298_v58 = vpop.f32.mrf.mxu0 }
 0x119   :  { %v405_v0 = vmul.f32 %v1448_v42, %v298_v58 }
 0x11a   :  { %v1109_v60 = vpop.f32.mrf.mxu0 }
 0x11b   :  { %v408_v62 = vmul.f32 %v1109_v60, %v1454_v49 }
 0x11c   :  { %v301_v63 = vpop.f32.mrf.mxu0 }
 0x11d   :  { %v406_v1 = vmul.f32 %v1452_v47, %v301_v63  ;;  %v416_v2 = vpack.c.bf16 %v408_v62, %v407_v61 }
 0x11f   :  { %v415_v5 = vpack.c.bf16 %v406_v1, %v405_v0  ;;  %1110 = vmatprep.subr.bf16.mxu1 %v416_v2 }
 0x120   :  { %1111 = vmatpush3.bf16.msra.mxu1 %v416_v2 }
 0x121   :  { %1112 = vmatprep.subr.bf16.mxu1 %v415_v5 }
 0x124   :  { %1113 = vmatpush3.bf16.msra.mxu1 %v415_v5 }
 0x125   :  { %1114 = vmatprep.subr.bf16.mxu1 %v414_v8 }
 0x128   :  { %1115 = vmatpush3.bf16.msra.mxu1 %v414_v8 }
 0x129   :  { %1116 = vmatprep.subr.bf16.mxu1 %v413_v14 }
 0x12c   :  { %1117 = vmatpush3.bf16.msra.mxu1 %v413_v14 }
 0x12d   :  { %1118 = vmatprep.subr.bf16.mxu1 %v412_v17 }
 0x130   :  { %1119 = vmatpush3.bf16.msra.mxu1 %v412_v17 }
 0x131   :  { %1120 = vmatprep.subr.bf16.mxu1 %v411_v22 }
 0x134   :  { %1121 = vmatpush3.bf16.msra.mxu1 %v411_v22 }
 0x135   :  { %1122 = vmatprep.subr.bf16.mxu1 %v410_v26 }
 0x138   :  { %1123 = vmatpush3.bf16.msra.mxu1 %v410_v26 }
 0x139   :  { %1124 = vmatprep.subr.bf16.mxu1 %v409_v29 }
 0x13c   :  { %1125 = vmatpush3.bf16.msra.mxu1 %v409_v29 }
 0x13f   :  { %1127 = vmatmul.mubr.bf16.vlgmr.msra.gmra.mxu1 %v1500_v30 }
 0x140   :  { %1130 = vmatprep.mubr.bf16.mxu1 %v1505_v31 }
 0x147   :  { %1131 = vmatmul.mubr.bf16.gmra.mxu1 %v1512_v32 }
 0x148   :  { %1134 = vmatprep.mubr.bf16.mxu1 %v1517_v34 }
 0x14f   :  { %1135 = vmatmul.mubr.bf16.gmra.mxu1 %v1524_v35 }
 0x150   :  { %1138 = vmatprep.mubr.bf16.mxu1 %v1529_v36 }
 0x157   :  { %1139 = vmatmul.mubr.bf16.gmra.mxu1 %v1536_v37 }
 0x158   :  { %1190 = vmatprep.mubr.bf16.mxu1 %v1443_v33  ;;  %v1545_v33 = vld [vmem:[%s1644_s4] ss:$0 sm:$0xff] }
 0x1ff   :  { %v1128_v43 = vpop.f32.mrf.mxu1 }
 0x200   :  { %v564_v48 = vmul.f32 %v1128_v43, %v1485_v19 }
 0x201   :  { %v499_v45 = vpop.f32.mrf.mxu1 }
 0x202   :  { %v562_v46 = vmul.f32 %v499_v45, %v1492_v25  ;;  %v587_v60 = vadd.f32 %v1545_v33, %v564_v48 }
 0x203   :  { %v1129_v50 = vpop.f32.mrf.mxu1 }
 0x204   :  { %v565_v51 = vmul.f32 %v1129_v50, %v1482_v16  ;;  %v585_v55 = vadd.f32 %v1545_v33, %v562_v46  ;;  %v603_v5 = vmax.f32 %v587_v60, 0.0 }
 0x205   :  { %v502_v53 = vpop.f32.mrf.mxu1 }
 0x206   :  { %v588_v56 = vadd.f32 %v1545_v33, %v565_v51  ;;  %v563_v58 = vmul.f32 %v502_v53, %v1489_v23  ;;  %v601_v1 = vmax.f32 %v585_v55, 0.0 }
 0x207   :  { %v1132_v61 = vpop.f32.mrf.mxu1 }
 0x208   :  { %v586_v62 = vadd.f32 %v1545_v33, %v563_v58  ;;  %v604_v63 = vmax.f32 %v588_v56, 0.0  ;;  %v568_v7 = vmul.f32 %v1132_v61, %v1471_v6 }
 0x209   :  { %v515_v0 = vpop.f32.mrf.mxu1 }
 0x20a   :  { %v602_v2 = vmax.f32 %v586_v62, 0.0  ;;  %v566_v4 = vmul.f32 %v515_v0, %v1478_v12  ;;  %v618_v13 = vpack.c.bf16 %v604_v63, %v603_v5  ;;  %v591_v20 = vadd.f32 %v1545_v33, %v568_v7 }
 0x20b   :  { %v1133_v8 = vpop.f32.mrf.mxu1 }
 0x20c   :  { %v569_v9 = vmul.f32 %v1133_v8, %v1468_v3  ;;  %v617_v11 = vpack.c.bf16 %v602_v2, %v601_v1  ;;  %v589_v15 = vadd.f32 %v1545_v33, %v566_v4  ;;  %v607_v38 = vmax.f32 %v591_v20, 0.0 }
 0x20d   :  { %v518_v14 = vpop.f32.mrf.mxu1 }
 0x20e   :  { %v592_v17 = vadd.f32 %v1545_v33, %v569_v9  ;;  %v567_v18 = vmul.f32 %v518_v14, %v1475_v10  ;;  %1158 = vmatprep.mubr.bf16.mxu0 %v617_v11  ;;  %v605_v27 = vmax.f32 %v589_v15, 0.0 }
 0x20f   :  { %v1136_v21 = vpop.f32.mrf.mxu1  ;;  %1159 = vmatmul.mubr.bf16.vlgmr.msra.gmra.mxu0 %v618_v13 }
 0x210   :  { %v590_v22 = vadd.f32 %v1545_v33, %v567_v18  ;;  %v608_v24 = vmax.f32 %v592_v17, 0.0  ;;  %v572_v39 = vmul.f32 %v1136_v21, %v1458_v54 }
 0x211   :  { %v531_v26 = vpop.f32.mrf.mxu1 }
 0x212   :  { %v606_v28 = vmax.f32 %v590_v22, 0.0  ;;  %v570_v29 = vmul.f32 %v531_v26, %v1462_v59  ;;  %v620_v46 = vpack.c.bf16 %v608_v24, %v607_v38  ;;  %v595_v53 = vadd.f32 %v1545_v33, %v572_v39 }
 0x213   :  { %v1137_v40 = vpop.f32.mrf.mxu1 }
 0x214   :  { %v573_v41 = vmul.f32 %v1137_v40, %v1456_v52  ;;  %v619_v43 = vpack.c.bf16 %v606_v28, %v605_v27  ;;  %v593_v48 = vadd.f32 %v1545_v33, %v570_v29  ;;  %v611_v0 = vmax.f32 %v595_v53, 0.0 }
 0x215   :  { %v534_v45 = vpop.f32.mrf.mxu1 }
 0x216   :  { %v596_v50 = vadd.f32 %v1545_v33, %v573_v41  ;;  %v571_v51 = vmul.f32 %v534_v45, %v1460_v57  ;;  %1162 = vmatprep.mubr.bf16.mxu0 %v619_v43  ;;  %v609_v61 = vmax.f32 %v593_v48, 0.0 }
 0x217   :  { %v1140_v55 = vpop.f32.mrf.mxu1  ;;  %1163 = vmatmul.mubr.bf16.gmra.mxu0 %v620_v46 }
 0x218   :  { %v594_v56 = vadd.f32 %v1545_v33, %v571_v51  ;;  %v612_v58 = vmax.f32 %v596_v50, 0.0  ;;  %v576_v1 = vmul.f32 %v1140_v55, %v1450_v44 }
 0x219   :  { %v547_v60 = vpop.f32.mrf.mxu1 }
 0x21a   :  { %v610_v62 = vmax.f32 %v594_v56, 0.0  ;;  %v574_v63 = vmul.f32 %v547_v60, %v1448_v42  ;;  %v622_v8 = vpack.c.bf16 %v612_v58, %v611_v0  ;;  %v599_v14 = vadd.f32 %v1545_v33, %v576_v1 }
 0x21b   :  { %v1141_v2 = vpop.f32.mrf.mxu1 }
 0x21c   :  { %v577_v4 = vmul.f32 %v1141_v2, %v1454_v49  ;;  %v621_v5 = vpack.c.bf16 %v610_v62, %v609_v61  ;;  %v597_v9 = vadd.f32 %v1545_v33, %v574_v63  ;;  %v615_v21 = vmax.f32 %v599_v14, 0.0 }
 0x21d   :  { %v550_v7 = vpop.f32.mrf.mxu1 }
 0x21e   :  { %v600_v11 = vadd.f32 %v1545_v33, %v577_v4  ;;  %v575_v13 = vmul.f32 %v550_v7, %v1452_v47  ;;  %1166 = vmatprep.mubr.bf16.mxu0 %v621_v5  ;;  %v613_v18 = vmax.f32 %v597_v9, 0.0 }
 0x21f   :  { %1167 = vmatmul.mubr.bf16.gmra.mxu0 %v622_v8 }
 0x220   :  { %v598_v15 = vadd.f32 %v1545_v33, %v575_v13  ;;  %v616_v17 = vmax.f32 %v600_v11, 0.0 }
 0x222   :  { %v614_v20 = vmax.f32 %v598_v15, 0.0  ;;  %v624_v24 = vpack.c.bf16 %v616_v17, %v615_v21 }
 0x224   :  { %v623_v22 = vpack.c.bf16 %v614_v20, %v613_v18 }
 0x226   :  { %1170 = vmatprep.mubr.bf16.mxu0 %v623_v22 }
 0x227   :  { %1171 = vmatmul.mubr.bf16.gmra.mxu0 %v624_v24 }
 0x2cf   :  { %v1160_v26 = vpop.f32.mrf.mxu0 }
 0x2d0   :  { %v788_v17 = vmul.f32 %v1160_v26, %v1485_v19  ;;  %v1603_v26 = vld [vmem:[%s1646_s6] ss:$0 sm:$0xff]  ;;  %s1319_s6 = smov [#allocation7]  }
 0x2d1   :  { %v723_v27 = vpop.f32.mrf.mxu0  ;;  %s967_s25 = sshll.u32 %s1319_s6, 4  ;;  %s968_s25 = int_to_ptr.vmem [resolvable:$true] %s967_s25 }
 0x2d2   :  { %v786_v21 = vmul.f32 %v723_v27, %v1492_v25  ;;  %s1288_s26 = scalar_lea.vmem %s968_s25, 2048  ;;  %p1293_p11 = scmp.lt.s32.totalorder %s968_s25, %s968_s25 }
 0x2d3   :  { %v1161_v28 = vpop.f32.mrf.mxu0  ;;  %p1289_p10 = scmp.ne.s32.totalorder %s968_s25, %s1288_s26  ;;  %p1294_p12 = scmp.lt.s32.totalorder %s1288_s26, %s1288_s26 }
 0x2d4   :  { %v789_v14 = vmul.f32 %v1161_v28, %v1482_v16 }
 0x2d5   :  { %v726_v29 = vpop.f32.mrf.mxu0  ;;  %p1295_p13 = por %p1294_p12, %p1293_p11 }
 0x2d6   :  { %v803_v18 = vpack.c.bf16 %v789_v14, %v788_v17  ;;  %v787_v20 = vmul.f32 %v726_v29, %v1489_v23 }
 0x2d7   :  { %v1164_v38 = vpop.f32.mrf.mxu0  ;;  %p1296_p0 = pnand %p1295_p13, %p1289_p10 }
 0x2d8   :  { %v792_v8 = vmul.f32 %v1164_v38, %v1471_v6  ;;  %v802_v22 = vpack.c.bf16 %v787_v20, %v786_v21 }
 0x2d9   :  { %v739_v39 = vpop.f32.mrf.mxu0 }
 0x2da   :  { %v790_v13 = vmul.f32 %v739_v39, %v1478_v12 }
 0x2db   :  { %v1165_v40 = vpop.f32.mrf.mxu0 }
 0x2dc   :  { %v793_v5 = vmul.f32 %v1165_v40, %v1468_v3 }
 0x2dd   :  { %v742_v41 = vpop.f32.mrf.mxu0 }
 0x2de   :  { %v805_v9 = vpack.c.bf16 %v793_v5, %v792_v8  ;;  %v791_v11 = vmul.f32 %v742_v41, %v1475_v10 }
 0x2df   :  { %v1168_v43 = vpop.f32.mrf.mxu0 }
 0x2e0   :  { %v796_v0 = vmul.f32 %v1168_v43, %v1458_v54  ;;  %v804_v15 = vpack.c.bf16 %v791_v11, %v790_v13 }
 0x2e1   :  { %v755_v45 = vpop.f32.mrf.mxu0 }
 0x2e2   :  { %v794_v4 = vmul.f32 %v755_v45, %v1462_v59 }
 0x2e3   :  { %v1169_v46 = vpop.f32.mrf.mxu0 }
 0x2e4   :  { %v797_v62 = vmul.f32 %v1169_v46, %v1456_v52 }
 0x2e5   :  { %v758_v33 = vpop.f32.mrf.mxu0 }
 0x2e6   :  { %v807_v1 = vpack.c.bf16 %v797_v62, %v796_v0  ;;  %v795_v2 = vmul.f32 %v758_v33, %v1460_v57 }
 0x2e7   :  { %v1172_v48 = vpop.f32.mrf.mxu0 }
 0x2e8   :  { %v800_v53 = vmul.f32 %v1172_v48, %v1450_v44  ;;  %v806_v7 = vpack.c.bf16 %v795_v2, %v794_v4 }
 0x2e9   :  { %v771_v50 = vpop.f32.mrf.mxu0 }
 0x2ea   :  { %v798_v58 = vmul.f32 %v771_v50, %v1448_v42 }
 0x2eb   :  { %v1173_v51 = vpop.f32.mrf.mxu0 }
 0x2ec   :  { %v801_v55 = vmul.f32 %v1173_v51, %v1454_v49 }
 0x2ed   :  { %v774_v56 = vpop.f32.mrf.mxu0 }
 0x2ee   :  { %v809_v60 = vpack.c.bf16 %v801_v55, %v800_v53  ;;  %v799_v61 = vmul.f32 %v774_v56, %v1452_v47 }
 0x2f0   :  { %v808_v63 = vpack.c.bf16 %v799_v61, %v798_v58  ;;  %1174 = vmatprep.subr.bf16.mxu1 %v809_v60 }
 0x2f1   :  { %1175 = vmatpush3.bf16.msra.mxu1 %v809_v60 }
 0x2f2   :  { %1176 = vmatprep.subr.bf16.mxu1 %v808_v63 }
 0x2f5   :  { %1177 = vmatpush3.bf16.msra.mxu1 %v808_v63 }
 0x2f6   :  { %1178 = vmatprep.subr.bf16.mxu1 %v807_v1 }
 0x2f9   :  { %1179 = vmatpush3.bf16.msra.mxu1 %v807_v1 }
 0x2fa   :  { %1180 = vmatprep.subr.bf16.mxu1 %v806_v7 }
 0x2fd   :  { %1181 = vmatpush3.bf16.msra.mxu1 %v806_v7 }
 0x2fe   :  { %1182 = vmatprep.subr.bf16.mxu1 %v805_v9 }
 0x301   :  { %1183 = vmatpush3.bf16.msra.mxu1 %v805_v9 }
 0x302   :  { %1184 = vmatprep.subr.bf16.mxu1 %v804_v15 }
 0x305   :  { %1185 = vmatpush3.bf16.msra.mxu1 %v804_v15 }
 0x306   :  { %1186 = vmatprep.subr.bf16.mxu1 %v803_v18 }
 0x309   :  { %1187 = vmatpush3.bf16.msra.mxu1 %v803_v18 }
 0x30a   :  { %1188 = vmatprep.subr.bf16.mxu1 %v802_v22 }
 0x30d   :  { %1189 = vmatpush3.bf16.msra.mxu1 %v802_v22 }
 0x310   :  { %1191 = vmatmul.mubr.bf16.vlgmr.msra.gmra.mxu1 %v1500_v30 }
 0x311   :  { %1194 = vmatprep.mubr.bf16.mxu1 %v1505_v31 }
 0x318   :  { %1195 = vmatmul.mubr.bf16.gmra.mxu1 %v1512_v32 }
 0x319   :  { %1198 = vmatprep.mubr.bf16.mxu1 %v1517_v34 }
 0x320   :  { %1199 = vmatmul.mubr.bf16.gmra.mxu1 %v1524_v35 }
 0x321   :  { %1202 = vmatprep.mubr.bf16.mxu1 %v1529_v36 }
 0x328   :  { %1203 = vmatmul.mubr.bf16.gmra.mxu1 %v1536_v37 }
 0x3d0   :  { %v1192_v24 = vpop.f32.mrf.mxu1 }
 0x3d1   :  { %v909_v30 = vmul.f32 %v1192_v24, %v1485_v19 }
 0x3d2   :  { %v844_v27 = vpop.f32.mrf.mxu1 }
 0x3d3   :  { %v932_v31 = vadd.f32 %v1603_v26, %v909_v30  ;;  %v907_v32 = vmul.f32 %v844_v27, %v1492_v25 }
 0x3d4   :  { %v1193_v34 = vpop.f32.mrf.mxu1 }
 0x3d5   :  { %948 = vst [vmem:[#allocation7 + $0x10] sm:$0xff] %v932_v31  ;;  %v930_v35 = vadd.f32 %v1603_v26, %v907_v32  ;;  %v910_v36 = vmul.f32 %v1193_v34, %v1482_v16 }
 0x3d6   :  { %v847_v37 = vpop.f32.mrf.mxu1 }
 0x3d7   :  { %946 = vst [vmem:[#allocation7] sm:$0xff] %v930_v35  ;;  %v933_v28 = vadd.f32 %v1603_v26, %v910_v36  ;;  %v908_v29 = vmul.f32 %v847_v37, %v1489_v23 }
 0x3d8   :  { %v1196_v38 = vpop.f32.mrf.mxu1 }
 0x3d9   :  { %949 = vst [vmem:[#allocation7 + $0x18] sm:$0xff] %v933_v28  ;;  %v931_v19 = vadd.f32 %v1603_v26, %v908_v29  ;;  %v913_v39 = vmul.f32 %v1196_v38, %v1471_v6 }
 0x3da   :  { %v860_v40 = vpop.f32.mrf.mxu1 }
 0x3db   :  { %947 = vst [vmem:[#allocation7 + $0x8] sm:$0xff] %v931_v19  ;;  %v936_v25 = vadd.f32 %v1603_v26, %v913_v39  ;;  %v911_v41 = vmul.f32 %v860_v40, %v1478_v12 }
 0x3dc   :  { %v1197_v43 = vpop.f32.mrf.mxu1 }
 0x3dd   :  { %952 = vst [vmem:[#allocation7 + $0x30] sm:$0xff] %v936_v25  ;;  %v934_v16 = vadd.f32 %v1603_v26, %v911_v41  ;;  %v914_v45 = vmul.f32 %v1197_v43, %v1468_v3 }
 0x3de   :  { %v863_v46 = vpop.f32.mrf.mxu1 }
 0x3df   :  { %950 = vst [vmem:[#allocation7 + $0x20] sm:$0xff] %v934_v16  ;;  %v937_v23 = vadd.f32 %v1603_v26, %v914_v45  ;;  %v912_v33 = vmul.f32 %v863_v46, %v1475_v10 }
 0x3e0   :  { %v1200_v48 = vpop.f32.mrf.mxu1 }
 0x3e1   :  { %953 = vst [vmem:[#allocation7 + $0x38] sm:$0xff] %v937_v23  ;;  %v935_v6 = vadd.f32 %v1603_v26, %v912_v33  ;;  %v917_v50 = vmul.f32 %v1200_v48, %v1458_v54 }
 0x3e2   :  { %v876_v51 = vpop.f32.mrf.mxu1 }
 0x3e3   :  { %951 = vst [vmem:[#allocation7 + $0x28] sm:$0xff] %v935_v6  ;;  %v940_v12 = vadd.f32 %v1603_v26, %v917_v50  ;;  %v915_v53 = vmul.f32 %v876_v51, %v1462_v59 }
 0x3e4   :  { %v1201_v55 = vpop.f32.mrf.mxu1 }
 0x3e5   :  { %956 = vst [vmem:[#allocation7 + $0x50] sm:$0xff] %v940_v12  ;;  %v938_v3 = vadd.f32 %v1603_v26, %v915_v53  ;;  %v918_v56 = vmul.f32 %v1201_v55, %v1456_v52 }
 0x3e6   :  { %v879_v58 = vpop.f32.mrf.mxu1 }
 0x3e7   :  { %954 = vst [vmem:[#allocation7 + $0x40] sm:$0xff] %v938_v3  ;;  %v941_v10 = vadd.f32 %v1603_v26, %v918_v56  ;;  %v916_v60 = vmul.f32 %v879_v58, %v1460_v57 }
 0x3e8   :  { %v1204_v61 = vpop.f32.mrf.mxu1 }
 0x3e9   :  { %957 = vst [vmem:[#allocation7 + $0x58] sm:$0xff] %v941_v10  ;;  %v939_v54 = vadd.f32 %v1603_v26, %v916_v60  ;;  %v921_v62 = vmul.f32 %v1204_v61, %v1450_v44 }
 0x3ea   :  { %v892_v63 = vpop.f32.mrf.mxu1 }
 0x3eb   :  { %955 = vst [vmem:[#allocation7 + $0x48] sm:$0xff] %v939_v54  ;;  %v944_v59 = vadd.f32 %v1603_v26, %v921_v62  ;;  %v919_v0 = vmul.f32 %v892_v63, %v1448_v42 }
 0x3ec   :  { %v1205_v1 = vpop.f32.mrf.mxu1 }
 0x3ed   :  { %960 = vst [vmem:[#allocation7 + $0x70] sm:$0xff] %v944_v59  ;;  %v942_v52 = vadd.f32 %v1603_v26, %v919_v0  ;;  %v922_v2 = vmul.f32 %v1205_v1, %v1454_v49 }
 0x3ee   :  { %v895_v57 = vpop.f32.mrf.mxu1 }
 0x3ef   :  { %958 = vst [vmem:[#allocation7 + $0x60] sm:$0xff] %v942_v52  ;;  %v945_v4 = vadd.f32 %v1603_v26, %v922_v2  ;;  %v920_v44 = vmul.f32 %v895_v57, %v1452_v47 }
 0x3f1   :  { %961 = vst [vmem:[#allocation7 + $0x78] sm:$0xff] %v945_v4  ;;  %v943_v5 = vadd.f32 %v1603_v26, %v920_v44 }
 0x3f3   :  { %959 = vst [vmem:[#allocation7 + $0x68] sm:$0xff] %v943_v5 }
 0x3f4   :  { %1299 = shalt.err (!%p1296_p0)
}
 0x3f5   :  { %s1320_s27 = smov 128   ;;  %s1321_s28 = smov 8  }
 0x3f6   :  { %973 = dma.vmem_to_hbm [thread:$0]  %s968_s25, 2048, %s1647_s7, [#allocation4], %s1320_s27, %s1320_s27, %s1321_s28  }
 0x3f7   :  { %1312 = dma.done.wait [#allocation4], 2048  }
 0x3f8   :  { %1313 = vsyncadd [#allocation4], 4294965248 }
 0x3f9   :  { %977 = vsyncpa [#allocation3], 1 }
 0x3fa   :  { %978 = vsyncpa [#allocation6], 1 }
 0x3fb   :  { %979 = vsyncpa [#allocation4], 1 }

</bundles_post_ra>
